<compile_context>
chip_gen: v6e
topology: v6e:2x2x1
jax: 0.10.0
libtpu: 0.0.40
codegen_flags: <defaults>
</compile_context>

<pallas_src>
import functools

import jax
import jax.numpy as jnp
from jax.experimental import pallas as pl
from jax.experimental.pallas import tpu as pltpu


# ----------------------------------------------------------------------------
# in-kernel helpers
# ----------------------------------------------------------------------------
def _layer_norm_f32(x, gamma, eps=1e-5):
    # x: (rows, dim) f32, gamma: (1, dim) f32 ; beta is zeros (buffer in torch)
    mean = jnp.mean(x, axis=-1, keepdims=True)
    var = jnp.mean(jnp.square(x - mean), axis=-1, keepdims=True)
    return (x - mean) * jax.lax.rsqrt(var + eps) * gamma


# ----------------------------------------------------------------------------
# kernel: one parallel transformer block + residual, for one batch element
# ----------------------------------------------------------------------------
def _block_kernel(x_ref, gamma_ref, wq_ref, wk_ref, wv_ref, wffx_ref,
                  wffg_ref, wa_ref, wff_ref, cos_ref, sin_ref, o_ref,
                  *, heads, dim_head):
    f32 = jnp.float32
    bf16 = jnp.bfloat16

    x = x_ref[0]                        # (n, dim) f32
    n = x.shape[0]
    gamma = gamma_ref[...]              # (1, dim) f32
    cos = cos_ref[...]                  # (n, dh) f32
    sin_s = sin_ref[...]                # (n, dh) f32, rotate_half sign folded in

    # ---- pre-norm (f32 math) ----
    xn = _layer_norm_f32(x, gamma)
    xn_bf = xn.astype(bf16)

    # ---- lane-dense projections (bf16 operands, f32 accumulation) ----
    # scale (dim_head ** -0.5) is folded into wq outside the kernel.
    q2 = jnp.dot(xn_bf, wq_ref[...], preferred_element_type=f32)    # (n, h*dh)
    k = jnp.dot(xn_bf, wk_ref[...], preferred_element_type=f32)     # (n, dh)   (multi-query)
    v = jnp.dot(xn_bf, wv_ref[...], preferred_element_type=f32)     # (n, dh)
    ffx = jnp.dot(xn_bf, wffx_ref[...], preferred_element_type=f32)  # (n, ff_inner)
    ffg = jnp.dot(xn_bf, wffg_ref[...], preferred_element_type=f32)  # (n, ff_inner)

    # ---- fold heads into rows: (n, h*dh) -> (h*n, dh) ----
    q_all = pltpu.einshape("nhd->hnd", q2.reshape(n, heads, dim_head))
    q_all = q_all.reshape(heads * n, dim_head)

    # ---- RoPE applied once to the whole Q block and once to K ----
    d2 = dim_head // 2
    cos_q = jnp.tile(cos, (heads, 1))         # (h*n, dh)
    sin_q = jnp.tile(sin_s, (heads, 1))       # (h*n, dh)
    q_sw = jnp.concatenate([q_all[:, d2:], q_all[:, :d2]], axis=-1)
    q_rot = q_all * cos_q + q_sw * sin_q
    k_sw = jnp.concatenate([k[:, d2:], k[:, :d2]], axis=-1)
    k_rot = k * cos + k_sw * sin_s

    # ---- multi-query causal attention: one matmul, one softmax, one matmul --
    # TODO(synk): for seq >= ~1K, tile the KV axis with an online-softmax
    # (flash-style) loop instead of materializing the (h*n, n) score block.
    sim = jnp.dot(q_rot.astype(bf16), k_rot.astype(bf16).T,
                  preferred_element_type=f32)                        # (h*n, n)
    row = jax.lax.broadcasted_iota(jnp.int32, (n, n), 0)
    col = jax.lax.broadcasted_iota(jnp.int32, (n, n), 1)
    bias = jnp.where(col > row, f32(-1e30), f32(0.0))                # bounded additive mask
    sim = sim + jnp.tile(bias, (heads, 1))
    sim = sim - jnp.max(sim, axis=-1, keepdims=True)
    p = jnp.exp(sim)
    attn = p * pl.reciprocal(jnp.sum(p, axis=-1, keepdims=True), approx=True)
    out_all = jnp.dot(attn.astype(bf16), v.astype(bf16),
                      preferred_element_type=f32)                    # (h*n, dh)

    # ---- restore (n, h*dh) layout and project ----
    out_cat = pltpu.einshape("hnd->nhd", out_all.reshape(heads, n, dim_head))
    out_cat = out_cat.reshape(n, heads * dim_head)
    attn_out = jnp.dot(out_cat.astype(bf16), wa_ref[...],
                       preferred_element_type=f32)                   # (n, dim)

    # ---- SwiGLU feed-forward (silu in f32) ----
    swiglu = (ffg * jax.nn.sigmoid(ffg)) * ffx                       # silu(gate) * x
    ff_out = jnp.dot(swiglu.astype(bf16), wff_ref[...],
                     preferred_element_type=f32)                     # (n, dim)

    # ---- parallel block output + residual ----
    o_ref[0] = attn_out + ff_out + x


# ----------------------------------------------------------------------------
# kernel: final LayerNorm + Linear head, on flattened (b*n, dim) rows
# ----------------------------------------------------------------------------
def _final_kernel(x_ref, gamma_ref, w_ref, o_ref):
    xn = _layer_norm_f32(x_ref[...], gamma_ref[...])
    o_ref[...] = jnp.dot(xn.astype(jnp.bfloat16), w_ref[...],
                         preferred_element_type=jnp.float32)


# ----------------------------------------------------------------------------
# wrappers
# ----------------------------------------------------------------------------
def palm_block(x, layer, cos, sin_signed, *, heads, dim_head):
    b, n, dim = x.shape
    attn_inner = heads * dim_head
    ff_inner = layer["wff_t"].shape[0]
    kernel = functools.partial(_block_kernel, heads=heads, dim_head=dim_head)

    def full(shape):
        return pl.BlockSpec(shape, lambda i: (0,) * len(shape))

    return pl.pallas_call(
        kernel,
        out_shape=jax.ShapeDtypeStruct((b, n, dim), jnp.float32),
        grid=(b,),
        in_specs=[
            pl.BlockSpec((1, n, dim), lambda i: (i, 0, 0)),   # x
            full((1, dim)),                                   # gamma
            full((dim, attn_inner)),                          # wq (scale folded, bf16)
            full((dim, dim_head)),                            # wk
            full((dim, dim_head)),                            # wv
            full((dim, ff_inner)),                            # wff_x
            full((dim, ff_inner)),                            # wff_gate
            full((attn_inner, dim)),                          # attn_out weight
            full((ff_inner, dim)),                            # ff_out weight
            full((n, dim_head)),                              # cos table
            full((n, dim_head)),                              # sin table (signed)
        ],
        out_specs=pl.BlockSpec((1, n, dim), lambda i: (i, 0, 0)),
        compiler_params=pltpu.CompilerParams(
            dimension_semantics=("parallel",)),
    )(x, layer["gamma"], layer["wq_t"], layer["wk_t"], layer["wv_t"],
      layer["wffx_t"], layer["wffg_t"], layer["wa_t"], layer["wff_t"],
      cos, sin_signed)


def palm_head(x, gamma, w_t):
    b, n, dim = x.shape
    rows = b * n
    xf = x.reshape(rows, dim)     # flatten batch*seq -> sublane-dense rows
    # NOTE: at toy size the whole (rows, dim) slab is one grid step; for large
    # b*n tile the row axis (e.g. 256 rows/step).
    out = pl.pallas_call(
        _final_kernel,
        out_shape=jax.ShapeDtypeStruct((rows, dim), jnp.float32),
        grid=(1,),
        in_specs=[
            pl.BlockSpec((rows, dim), lambda i: (0, 0)),
            pl.BlockSpec((1, dim), lambda i: (0, 0)),
            pl.BlockSpec((dim, dim), lambda i: (0, 0)),
        ],
        out_specs=pl.BlockSpec((rows, dim), lambda i: (0, 0)),
    )(xf, gamma, w_t)
    return out.reshape(b, n, dim)


def tiny_palm2_forward(x, params, *, heads, dim_head, ff_mult):
    del ff_mult  # ff_inner is derived from the stored weights
    n = x.shape[1]

    # RoPE tables (n, dim_head); rotate_half's sign is folded into sin.
    inv_freq = 1.0 / (10000.0 ** (jnp.arange(0, dim_head, 2, dtype=jnp.float32)
                                  / dim_head))
    seq_pos = jnp.arange(n, dtype=jnp.float32)
    freqs = seq_pos[:, None] * inv_freq[None, :]                 # (n, dh/2)
    cos = jnp.concatenate([jnp.cos(freqs), jnp.cos(freqs)], axis=-1)
    sin_signed = jnp.concatenate([-jnp.sin(freqs), jnp.sin(freqs)], axis=-1)

    out = x
    for layer in params["blocks"]:
        out = palm_block(out, layer, cos, sin_signed,
                         heads=heads, dim_head=dim_head)
    return palm_head(out, params["final_gamma"], params["final_w_t"])


def init_params(key, dim, depth, dim_head, heads, ff_mult):
    attn_inner = dim_head * heads
    ff_inner = dim * ff_mult
    fused_total = attn_inner + dim_head + dim_head + 2 * ff_inner
    scale = dim_head ** -0.5
    blocks = []
    for layer_idx in range(depth):
        k = jax.random.fold_in(key, layer_idx)
        k1, k2, k3 = jax.random.split(k, 3)
        # torch fused Linear column layout: [q | k | v | ff_x | ff_gate]
        wf_t = 0.02 * jax.random.normal(k1, (dim, fused_total), jnp.float32)
        q_end = attn_inner
        k_end = q_end + dim_head
        v_end = k_end + dim_head
        ffx_end = v_end + ff_inner
        blocks.append({
            # weights stored transposed: (in_features, out_features), bf16
            "wq_t": (wf_t[:, :q_end] * scale).astype(jnp.bfloat16),   # scale folded in
            "wk_t": wf_t[:, q_end:k_end].astype(jnp.bfloat16),
            "wv_t": wf_t[:, k_end:v_end].astype(jnp.bfloat16),
            "wffx_t": wf_t[:, v_end:ffx_end].astype(jnp.bfloat16),
            "wffg_t": wf_t[:, ffx_end:].astype(jnp.bfloat16),
            "wa_t": (0.02 * jax.random.normal(k2, (attn_inner, dim),
                                              jnp.float32)).astype(jnp.bfloat16),
            "wff_t": (0.02 * jax.random.normal(k3, (ff_inner, dim),
                                               jnp.float32)).astype(jnp.bfloat16),
            "gamma": jnp.ones((1, dim), jnp.float32),
        })
    kf = jax.random.fold_in(key, 10_000)
    return {
        "blocks": blocks,
        "final_gamma": jnp.ones((1, dim), jnp.float32),
        "final_w_t": (0.02 * jax.random.normal(kf, (dim, dim),
                                               jnp.float32)).astype(jnp.bfloat16),
    }


if __name__ == "__main__":
    # small config consistent with TinyPalm2(dim=32, depth=2, dim_head=16, heads=4)
    batch, seq, dim = 2, 8, 32
    depth, dim_head, heads, ff_mult = 2, 16, 4, 4

    key = jax.random.PRNGKey(0)
    kx, kp = jax.random.split(key)
    x = jax.random.normal(kx, (batch, seq, dim), jnp.float32)
    params = init_params(kp, dim, depth, dim_head, heads, ff_mult)

    out = tiny_palm2_forward(x, params, heads=heads, dim_head=dim_head,
                             ff_mult=ff_mult)
    out = jax.block_until_ready(out)
    assert out.shape == (batch, seq, dim)
    assert bool(jnp.all(jnp.isfinite(out)))
    print("KERNEL_OK")
</pallas_src>

<mosaic_0001>
module attributes {stable_mosaic.version = 11 : i64} {
  func.func @_block_kernel(%arg0: i32, %arg1: memref<1x8x32xf32, #tpu.memory_space<vmem>>, %arg2: memref<1x32xf32, #tpu.memory_space<vmem>>, %arg3: memref<32x64xbf16, #tpu.memory_space<vmem>>, %arg4: memref<32x16xbf16, #tpu.memory_space<vmem>>, %arg5: memref<32x16xbf16, #tpu.memory_space<vmem>>, %arg6: memref<32x128xbf16, #tpu.memory_space<vmem>>, %arg7: memref<32x128xbf16, #tpu.memory_space<vmem>>, %arg8: memref<64x32xbf16, #tpu.memory_space<vmem>>, %arg9: memref<128x32xbf16, #tpu.memory_space<vmem>>, %arg10: memref<8x16xf32, #tpu.memory_space<vmem>>, %arg11: memref<8x16xf32, #tpu.memory_space<vmem>>, %arg12: memref<1x8x32xf32, #tpu.memory_space<vmem>>) attributes {dimension_semantics = [#tpu.dimension_semantics<parallel>], iteration_bounds = array<i64: 2>, scalar_prefetch = 0 : i64, scratch_operands = 0 : i64, tpu.core_type = #tpu.core_type<tc>, window_params = [{transform_indices = @transform_0, window_bounds = array<i64: 1, 8, 32>}, {pipeline_mode = #tpu.pipeline_mode<synchronous>, transform_indices = @transform_1, window_bounds = array<i64: 1, 32>}, {pipeline_mode = #tpu.pipeline_mode<synchronous>, transform_indices = @transform_2, window_bounds = array<i64: 32, 64>}, {pipeline_mode = #tpu.pipeline_mode<synchronous>, transform_indices = @transform_3, window_bounds = array<i64: 32, 16>}, {pipeline_mode = #tpu.pipeline_mode<synchronous>, transform_indices = @transform_4, window_bounds = array<i64: 32, 16>}, {pipeline_mode = #tpu.pipeline_mode<synchronous>, transform_indices = @transform_5, window_bounds = array<i64: 32, 128>}, {pipeline_mode = #tpu.pipeline_mode<synchronous>, transform_indices = @transform_6, window_bounds = array<i64: 32, 128>}, {pipeline_mode = #tpu.pipeline_mode<synchronous>, transform_indices = @transform_7, window_bounds = array<i64: 64, 32>}, {pipeline_mode = #tpu.pipeline_mode<synchronous>, transform_indices = @transform_8, window_bounds = array<i64: 128, 32>}, {pipeline_mode = #tpu.pipeline_mode<synchronous>, transform_indices = @transform_9, window_bounds = array<i64: 8, 16>}, {pipeline_mode = #tpu.pipeline_mode<synchronous>, transform_indices = @transform_10, window_bounds = array<i64: 8, 16>}, {transform_indices = @transform_11, window_bounds = array<i64: 1, 8, 32>}]} {
    %c0 = arith.constant 0 : index
    %c0_0 = arith.constant 0 : index
    %c0_1 = arith.constant 0 : index
    %0 = vector.load %arg1[%c0, %c0_0, %c0_1] : memref<1x8x32xf32, #tpu.memory_space<vmem>>, vector<1x8x32xf32>
    %1 = vector.shape_cast %0 : vector<1x8x32xf32> to vector<8x32xf32>
    %c0_2 = arith.constant 0 : index
    %c0_3 = arith.constant 0 : index
    %2 = vector.load %arg2[%c0_2, %c0_3] : memref<1x32xf32, #tpu.memory_space<vmem>>, vector<1x32xf32>
    %c0_4 = arith.constant 0 : index
    %c0_5 = arith.constant 0 : index
    %3 = vector.load %arg10[%c0_4, %c0_5] : memref<8x16xf32, #tpu.memory_space<vmem>>, vector<8x16xf32>
    %c0_6 = arith.constant 0 : index
    %c0_7 = arith.constant 0 : index
    %4 = vector.load %arg11[%c0_6, %c0_7] : memref<8x16xf32, #tpu.memory_space<vmem>>, vector<8x16xf32>
    %cst = arith.constant dense<0.000000e+00> : vector<8xf32>
    %5 = vector.multi_reduction <add>, %1, %cst [1] : vector<8x32xf32> to vector<8xf32>
    %6 = vector.shape_cast %5 : vector<8xf32> to vector<8x1xf32>
    %cst_8 = arith.constant 3.200000e+01 : f32
    %7 = vector.broadcast %cst_8 : f32 to vector<8x1xf32>
    %8 = arith.divf %6, %7 : vector<8x1xf32>
    %9 = vector.broadcast %8 : vector<8x1xf32> to vector<8x32xf32>
    %10 = arith.subf %1, %9 : vector<8x32xf32>
    %11 = arith.mulf %10, %10 : vector<8x32xf32>
    %cst_9 = arith.constant dense<0.000000e+00> : vector<8xf32>
    %12 = vector.multi_reduction <add>, %11, %cst_9 [1] : vector<8x32xf32> to vector<8xf32>
    %13 = vector.shape_cast %12 : vector<8xf32> to vector<8x1xf32>
    %cst_10 = arith.constant 3.200000e+01 : f32
    %14 = vector.broadcast %cst_10 : f32 to vector<8x1xf32>
    %15 = arith.divf %13, %14 : vector<8x1xf32>
    %16 = vector.broadcast %8 : vector<8x1xf32> to vector<8x32xf32>
    %17 = arith.subf %1, %16 : vector<8x32xf32>
    %cst_11 = arith.constant 9.99999974E-6 : f32
    %18 = vector.broadcast %cst_11 : f32 to vector<8x1xf32>
    %19 = arith.addf %15, %18 : vector<8x1xf32>
    %20 = math.rsqrt %19 : vector<8x1xf32>
    %21 = vector.broadcast %20 : vector<8x1xf32> to vector<8x32xf32>
    %22 = arith.mulf %17, %21 : vector<8x32xf32>
    %23 = vector.broadcast %2 : vector<1x32xf32> to vector<8x32xf32>
    %24 = arith.mulf %22, %23 : vector<8x32xf32>
    %25 = arith.truncf %24 : vector<8x32xf32> to vector<8x32xbf16>
    %c0_12 = arith.constant 0 : index
    %c0_13 = arith.constant 0 : index
    %26 = vector.load %arg3[%c0_12, %c0_13] : memref<32x64xbf16, #tpu.memory_space<vmem>>, vector<32x64xbf16>
    %cst_14 = arith.constant dense<0.000000e+00> : vector<8x64xf32>
    %27 = tpu.matmul %25, %26, %cst_14 {dimension_numbers = #tpu.dot_dimension_numbers<[1], [0], [0], [1], [0, 0, 1, 1], [], []>} : vector<8x32xbf16>, vector<32x64xbf16>, vector<8x64xf32> -> vector<8x64xf32>
    %c0_15 = arith.constant 0 : index
    %c0_16 = arith.constant 0 : index
    %28 = vector.load %arg4[%c0_15, %c0_16] : memref<32x16xbf16, #tpu.memory_space<vmem>>, vector<32x16xbf16>
    %cst_17 = arith.constant dense<0.000000e+00> : vector<8x16xf32>
    %29 = tpu.matmul %25, %28, %cst_17 {dimension_numbers = #tpu.dot_dimension_numbers<[1], [0], [0], [1], [0, 0, 1, 1], [], []>} : vector<8x32xbf16>, vector<32x16xbf16>, vector<8x16xf32> -> vector<8x16xf32>
    %c0_18 = arith.constant 0 : index
    %c0_19 = arith.constant 0 : index
    %30 = vector.load %arg5[%c0_18, %c0_19] : memref<32x16xbf16, #tpu.memory_space<vmem>>, vector<32x16xbf16>
    %cst_20 = arith.constant dense<0.000000e+00> : vector<8x16xf32>
    %31 = tpu.matmul %25, %30, %cst_20 {dimension_numbers = #tpu.dot_dimension_numbers<[1], [0], [0], [1], [0, 0, 1, 1], [], []>} : vector<8x32xbf16>, vector<32x16xbf16>, vector<8x16xf32> -> vector<8x16xf32>
    %c0_21 = arith.constant 0 : index
    %c0_22 = arith.constant 0 : index
    %32 = vector.load %arg6[%c0_21, %c0_22] : memref<32x128xbf16, #tpu.memory_space<vmem>>, vector<32x128xbf16>
    %cst_23 = arith.constant dense<0.000000e+00> : vector<8x128xf32>
    %33 = tpu.matmul %25, %32, %cst_23 {dimension_numbers = #tpu.dot_dimension_numbers<[1], [0], [0], [1], [0, 0, 1, 1], [], []>} : vector<8x32xbf16>, vector<32x128xbf16>, vector<8x128xf32> -> vector<8x128xf32>
    %c0_24 = arith.constant 0 : index
    %c0_25 = arith.constant 0 : index
    %34 = vector.load %arg7[%c0_24, %c0_25] : memref<32x128xbf16, #tpu.memory_space<vmem>>, vector<32x128xbf16>
    %cst_26 = arith.constant dense<0.000000e+00> : vector<8x128xf32>
    %35 = tpu.matmul %25, %34, %cst_26 {dimension_numbers = #tpu.dot_dimension_numbers<[1], [0], [0], [1], [0, 0, 1, 1], [], []>} : vector<8x32xbf16>, vector<32x128xbf16>, vector<8x128xf32> -> vector<8x128xf32>
    %36 = vector.shape_cast %27 : vector<8x64xf32> to vector<8x4x16xf32>
    %37 = tpu.transpose %36, [1, 0, 2] : vector<8x4x16xf32> -> vector<4x8x16xf32>
    %38 = vector.shape_cast %37 : vector<4x8x16xf32> to vector<32x16xf32>
    %39 = tpu.concatenate %3, %3, %3, %3 in 0 : vector<8x16xf32>, vector<8x16xf32>, vector<8x16xf32>, vector<8x16xf32> -> vector<32x16xf32>
    %40 = tpu.concatenate %4, %4, %4, %4 in 0 : vector<8x16xf32>, vector<8x16xf32>, vector<8x16xf32>, vector<8x16xf32> -> vector<32x16xf32>
    %41 = vector.extract_strided_slice %38 {offsets = [0, 8], sizes = [32, 8], strides = [1, 1]} : vector<32x16xf32> to vector<32x8xf32>
    %42 = vector.extract_strided_slice %38 {offsets = [0, 0], sizes = [32, 8], strides = [1, 1]} : vector<32x16xf32> to vector<32x8xf32>
    %43 = tpu.concatenate %41, %42 in 1 : vector<32x8xf32>, vector<32x8xf32> -> vector<32x16xf32>
    %44 = arith.mulf %38, %39 : vector<32x16xf32>
    %45 = arith.mulf %43, %40 : vector<32x16xf32>
    %46 = arith.addf %44, %45 : vector<32x16xf32>
    %47 = vector.extract_strided_slice %29 {offsets = [0, 8], sizes = [8, 8], strides = [1, 1]} : vector<8x16xf32> to vector<8x8xf32>
    %48 = vector.extract_strided_slice %29 {offsets = [0, 0], sizes = [8, 8], strides = [1, 1]} : vector<8x16xf32> to vector<8x8xf32>
    %49 = tpu.concatenate %47, %48 in 1 : vector<8x8xf32>, vector<8x8xf32> -> vector<8x16xf32>
    %50 = arith.mulf %29, %3 : vector<8x16xf32>
    %51 = arith.mulf %49, %4 : vector<8x16xf32>
    %52 = arith.addf %50, %51 : vector<8x16xf32>
    %53 = arith.truncf %46 : vector<32x16xf32> to vector<32x16xbf16>
    %54 = arith.truncf %52 : vector<8x16xf32> to vector<8x16xbf16>
    %55 = tpu.transpose %54, [1, 0] : vector<8x16xbf16> -> vector<16x8xbf16>
    %cst_27 = arith.constant dense<0.000000e+00> : vector<32x8xf32>
    %56 = tpu.matmul %53, %55, %cst_27 {dimension_numbers = #tpu.dot_dimension_numbers<[1], [0], [0], [1], [0, 0, 1, 1], [], []>} : vector<32x16xbf16>, vector<16x8xbf16>, vector<32x8xf32> -> vector<32x8xf32>
    %57 = tpu.iota {dimensions = array<i32: 0>} : vector<8x8xi32>
    %58 = tpu.iota {dimensions = array<i32: 1>} : vector<8x8xi32>
    %59 = arith.cmpi sgt, %58, %57 : vector<8x8xi32>
    %cst_28 = arith.constant -1.000000e+30 : f32
    %cst_29 = arith.constant 0.000000e+00 : f32
    %60 = vector.broadcast %cst_28 : f32 to vector<8x8xf32>
    %61 = vector.broadcast %cst_29 : f32 to vector<8x8xf32>
    %62 = arith.select %59, %60, %61 : vector<8x8xi1>, vector<8x8xf32>
    %63 = tpu.concatenate %62, %62, %62, %62 in 0 : vector<8x8xf32>, vector<8x8xf32>, vector<8x8xf32>, vector<8x8xf32> -> vector<32x8xf32>
    %64 = arith.addf %56, %63 : vector<32x8xf32>
    %cst_30 = arith.constant dense<0xFF800000> : vector<32xf32>
    %65 = vector.multi_reduction <maximumf>, %64, %cst_30 [1] : vector<32x8xf32> to vector<32xf32>
    %66 = vector.shape_cast %65 : vector<32xf32> to vector<32x1xf32>
    %67 = vector.broadcast %66 : vector<32x1xf32> to vector<32x8xf32>
    %68 = arith.subf %64, %67 : vector<32x8xf32>
    %69 = math.exp %68 : vector<32x8xf32>
    %cst_31 = arith.constant dense<0.000000e+00> : vector<32xf32>
    %70 = vector.multi_reduction <add>, %69, %cst_31 [1] : vector<32x8xf32> to vector<32xf32>
    %71 = vector.shape_cast %70 : vector<32xf32> to vector<32x1xf32>
    %72 = tpu.reciprocal %71 {approx = true} : vector<32x1xf32> -> vector<32x1xf32>
    %73 = vector.broadcast %72 : vector<32x1xf32> to vector<32x8xf32>
    %74 = arith.mulf %69, %73 : vector<32x8xf32>
    %75 = arith.truncf %74 : vector<32x8xf32> to vector<32x8xbf16>
    %76 = arith.truncf %31 : vector<8x16xf32> to vector<8x16xbf16>
    %cst_32 = arith.constant dense<0.000000e+00> : vector<32x16xf32>
    %77 = tpu.matmul %75, %76, %cst_32 {dimension_numbers = #tpu.dot_dimension_numbers<[1], [0], [0], [1], [0, 0, 1, 1], [], []>} : vector<32x8xbf16>, vector<8x16xbf16>, vector<32x16xf32> -> vector<32x16xf32>
    %78 = vector.shape_cast %77 : vector<32x16xf32> to vector<4x8x16xf32>
    %79 = tpu.transpose %78, [1, 0, 2] : vector<4x8x16xf32> -> vector<8x4x16xf32>
    %80 = vector.shape_cast %79 : vector<8x4x16xf32> to vector<8x64xf32>
    %81 = arith.truncf %80 : vector<8x64xf32> to vector<8x64xbf16>
    %c0_33 = arith.constant 0 : index
    %c0_34 = arith.constant 0 : index
    %82 = vector.load %arg8[%c0_33, %c0_34] : memref<64x32xbf16, #tpu.memory_space<vmem>>, vector<64x32xbf16>
    %cst_35 = arith.constant dense<0.000000e+00> : vector<8x32xf32>
    %83 = tpu.matmul %81, %82, %cst_35 {dimension_numbers = #tpu.dot_dimension_numbers<[1], [0], [0], [1], [0, 0, 1, 1], [], []>} : vector<8x64xbf16>, vector<64x32xbf16>, vector<8x32xf32> -> vector<8x32xf32>
    %84 = arith.negf %35 : vector<8x128xf32>
    %85 = math.exp %84 : vector<8x128xf32>
    %cst_36 = arith.constant 1.000000e+00 : f32
    %86 = vector.broadcast %cst_36 : f32 to vector<8x128xf32>
    %87 = arith.addf %86, %85 : vector<8x128xf32>
    %88 = arith.divf %86, %87 : vector<8x128xf32>
    %89 = arith.mulf %35, %88 : vector<8x128xf32>
    %90 = arith.mulf %89, %33 : vector<8x128xf32>
    %91 = arith.truncf %90 : vector<8x128xf32> to vector<8x128xbf16>
    %c0_37 = arith.constant 0 : index
    %c0_38 = arith.constant 0 : index
    %92 = vector.load %arg9[%c0_37, %c0_38] : memref<128x32xbf16, #tpu.memory_space<vmem>>, vector<128x32xbf16>
    %cst_39 = arith.constant dense<0.000000e+00> : vector<8x32xf32>
    %93 = tpu.matmul %91, %92, %cst_39 {dimension_numbers = #tpu.dot_dimension_numbers<[1], [0], [0], [1], [0, 0, 1, 1], [], []>} : vector<8x128xbf16>, vector<128x32xbf16>, vector<8x32xf32> -> vector<8x32xf32>
    %94 = arith.addf %83, %93 : vector<8x32xf32>
    %95 = arith.addf %94, %1 : vector<8x32xf32>
    %c0_40 = arith.constant 0 : index
    %c0_41 = arith.constant 0 : index
    %c0_42 = arith.constant 0 : index
    %96 = vector.load %arg12[%c0_40, %c0_41, %c0_42] : memref<1x8x32xf32, #tpu.memory_space<vmem>>, vector<1x8x32xf32>
    %97 = vector.shape_cast %96 : vector<1x8x32xf32> to vector<8x32xf32>
    %98 = vector.shape_cast %95 : vector<8x32xf32> to vector<1x8x32xf32>
    tpu.vector_store %arg12[%c0_40, %c0_41, %c0_42], %98 {strides = array<i32>} : memref<1x8x32xf32, #tpu.memory_space<vmem>>, vector<1x8x32xf32>,
    return
  }
  func.func @transform_0(%arg0: i32) -> (i32, i32, i32) {
    %c0_i32 = arith.constant 0 : i32
    %c0_i32_0 = arith.constant 0 : i32
    %c0_i32_1 = arith.constant 0 : i32
    return %arg0, %c0_i32, %c0_i32_0 : i32, i32, i32
  }
  func.func @transform_1(%arg0: i32) -> (i32, i32) {
    %c0_i32 = arith.constant 0 : i32
    %c0_i32_0 = arith.constant 0 : i32
    %c0_i32_1 = arith.constant 0 : i32
    return %c0_i32, %c0_i32_0 : i32, i32
  }
  func.func @transform_2(%arg0: i32) -> (i32, i32) {
    %c0_i32 = arith.constant 0 : i32
    %c0_i32_0 = arith.constant 0 : i32
    %c0_i32_1 = arith.constant 0 : i32
    return %c0_i32, %c0_i32_0 : i32, i32
  }
  func.func @transform_3(%arg0: i32) -> (i32, i32) {
    %c0_i32 = arith.constant 0 : i32
    %c0_i32_0 = arith.constant 0 : i32
    %c0_i32_1 = arith.constant 0 : i32
    return %c0_i32, %c0_i32_0 : i32, i32
  }
  func.func @transform_4(%arg0: i32) -> (i32, i32) {
    %c0_i32 = arith.constant 0 : i32
    %c0_i32_0 = arith.constant 0 : i32
    %c0_i32_1 = arith.constant 0 : i32
    return %c0_i32, %c0_i32_0 : i32, i32
  }
  func.func @transform_5(%arg0: i32) -> (i32, i32) {
    %c0_i32 = arith.constant 0 : i32
    %c0_i32_0 = arith.constant 0 : i32
    %c0_i32_1 = arith.constant 0 : i32
    return %c0_i32, %c0_i32_0 : i32, i32
  }
  func.func @transform_6(%arg0: i32) -> (i32, i32) {
    %c0_i32 = arith.constant 0 : i32
    %c0_i32_0 = arith.constant 0 : i32
    %c0_i32_1 = arith.constant 0 : i32
    return %c0_i32, %c0_i32_0 : i32, i32
  }
  func.func @transform_7(%arg0: i32) -> (i32, i32) {
    %c0_i32 = arith.constant 0 : i32
    %c0_i32_0 = arith.constant 0 : i32
    %c0_i32_1 = arith.constant 0 : i32
    return %c0_i32, %c0_i32_0 : i32, i32
  }
  func.func @transform_8(%arg0: i32) -> (i32, i32) {
    %c0_i32 = arith.constant 0 : i32
    %c0_i32_0 = arith.constant 0 : i32
    %c0_i32_1 = arith.constant 0 : i32
    return %c0_i32, %c0_i32_0 : i32, i32
  }
  func.func @transform_9(%arg0: i32) -> (i32, i32) {
    %c0_i32 = arith.constant 0 : i32
    %c0_i32_0 = arith.constant 0 : i32
    %c0_i32_1 = arith.constant 0 : i32
    return %c0_i32, %c0_i32_0 : i32, i32
  }
  func.func @transform_10(%arg0: i32) -> (i32, i32) {
    %c0_i32 = arith.constant 0 : i32
    %c0_i32_0 = arith.constant 0 : i32
    %c0_i32_1 = arith.constant 0 : i32
    return %c0_i32, %c0_i32_0 : i32, i32
  }
  func.func @transform_11(%arg0: i32) -> (i32, i32, i32) {
    %c0_i32 = arith.constant 0 : i32
    %c0_i32_0 = arith.constant 0 : i32
    %c0_i32_1 = arith.constant 0 : i32
    return %arg0, %c0_i32, %c0_i32_0 : i32, i32, i32
  }
}

</mosaic_0001>

<bundles_post_ra>
// kernel: tpu_custom_call.1
= control target key start
LH: loop header
LB: loop body
LE: loop exit
PB: predicated region body
PF: predicated region fallthrough
CT: control target
= control target key end

     0   :  { %s2216_s0 = inlined_call_operand.vmem [shape: f32[2,8,32], index: 0, kind: input, shape index: {}]   ;;  %s2217_s1 = inlined_call_operand.vmem [shape: f32[1,32], index: 1, kind: input, shape index: {}]   ;;  %s2218_s2 = inlined_call_operand.vmem [shape: bf16[32,64], index: 2, kind: input, shape index: {}]   ;;  %s2219_s3 = inlined_call_operand.vmem [shape: bf16[32,16], index: 3, kind: input, shape index: {}]   ;;  %s2220_s4 = inlined_call_operand.vmem [shape: bf16[32,16], index: 4, kind: input, shape index: {}]   ;;  %s2221_s5 = inlined_call_operand.vmem [shape: bf16[32,128], index: 5, kind: input, shape index: {}]   ;;  %s2222_s6 = inlined_call_operand.vmem [shape: bf16[32,128], index: 6, kind: input, shape index: {}]   ;;  %s2223_s7 = inlined_call_operand.vmem [shape: bf16[64,32], index: 7, kind: input, shape index: {}]   ;;  %s2224_s8 = inlined_call_operand.vmem [shape: bf16[128,32], index: 8, kind: input, shape index: {}]   ;;  %s2225_s9 = inlined_call_operand.vmem [shape: f32[8,16], index: 9, kind: input, shape index: {}]   ;;  %s2226_s10 = inlined_call_operand.vmem [shape: f32[8,16], index: 10, kind: input, shape index: {}]   ;;  %s2227_s11 = inlined_call_operand.hbm [shape: f32[2,8,32], index: 11, kind: output, shape index: {}]  }
   0x1   :  { %2228 = sst [smem:[#allocation5_spill]] %s2216_s0 }
   0x2   :  { %16 = vsyncpa [#allocation3], 0 }
   0x3   :  { %18 = vsyncpa [#allocation3 + $0x1], 0  ;;  %s1885_s17 = smov 0   ;;  %s1887_s18 = smov 0  }
   0x4   :  { %s1889_s19 = smov 0   ;;  %s1891_s20 = smov 0  }
   0x5 LB: > { %s1906_s21 = sadd.s32 4294967295, %s1810_s20   ;;  %s1486_s22 = sadd.s32 4294967294, %s1810_s20   ;;  %s1810_s20 = sphi %s1891_s20, %s2235_s20   ;;  %s1806_s19 = sphi %s1889_s19, %s2234_s19   ;;  %s1802_s18 = sphi %s1887_s18, %s2233_s18   ;;  %s1798_s17 = sphi %s1885_s17, %s2232_s17  }
   0x6   : > { %s1910_s23 = sadd.s32 1, %s1810_s20   ;;  %s267_s24 = sadd.s32 1, %s1806_s19 }
   0x7   : > { %s264_s25 = ssub.s32 %s1810_s20, %s1910_s23  ;;  %p277_p0 = scmp.ne.s32.totalorder %s1806_s19, %s1802_s18 }
   0x8   : > { %p265_p1 = scmp.eq.s32.totalorder %s264_s25, 0  ;;  %p278_p2 = scmp.eq.s32.totalorder %s1906_s21, 1 }
   0x9   : > { %p283_p3 = scmp.ne.s32.totalorder %s1802_s18, %s1798_s17  ;;  %p284_p4 = scmp.eq.s32.totalorder %s1486_s22, 1 }
   0xa   : > { %s1921_s26 = scalar_select %p265_p1, %s1806_s19, %s267_s24  }
   0xb   : > { %p1923_p5 = por %p278_p2, %p277_p0  ;;  %p1927_p6 = por %p284_p4, %p283_p3 }
   0xc   : > { %p1489_p7 = scmp.ge.s32.totalorder %s1810_s20, 1  ;;  %p339_p8 = scmp.lt.s32.totalorder %s1810_s20, 3 }
   0xe   : > { %p340_p9 = pnand %p1489_p7, %p339_p8 }
   0xf   : > { %p378_p10 = scmp.lt.s32.totalorder (!%p340_p9), %s1906_s21, 1  ;;  %s2231_s0 = sld [smem:[#allocation5_spill]] (!%p340_p9) }
  0x10   : > { %343 = sbr.rel (%p340_p9) target bundleno = 1876 (0x754), region = 64  ;;  %s1814_s22 = smov (!%p340_p9), 80  }
  0x11   : > { %s1815_s24 = smov (!%p340_p9), 112   ;;  %s1816_s25 = smov (!%p340_p9), 96  }
  0x12   : > { %s1823_s12 = smov (!%p340_p9), 48   ;;  %s375_s13 = sand.u32 (!%p340_p9), 1, %s1802_s18  }
  0x13   : > { %s1531_s15 = sshll.u32 (!%p340_p9), %s1906_s21, 7 }
  0x15   : > { %s379_s29 = scalar_select %p378_p10, %s1906_s21, 1  ;;  %vm387_vm0 = vcmask 261120   ;;  %v1706_v7 = vld [vmem:[%s2218_s2 + $0x8] sm:$0xff]   ;;  %v1812_v9 = vmov 0.0   ;;  %v1708_v10 = vld [vmem:[%s2218_s2] sm:$0xff]   ;;  %vm1813_vm1 = vmmov 0   ;;  %v708_v56 = vlaneseq }
  0x16   : > { %v1707_v8 = vld [vmem:[%s2219_s3 + $0x8] sm:$0xff]   ;;  %1569 = vmatprep.subr.bf16.mxu0 %v1812_v9  ;;  %1577 = vmatprep.subr.bf16.mxu1 %v1812_v9  ;;  %v1709_v11 = vld [vmem:[%s2219_s3] sm:$0xff]   ;;  %vm1016_vm2 = vcmask 1043456   ;;  %v1819_v54 = vmov 1983009808   ;;  %vm867_vm3 = vcmask 64512  }
  0x17   : > { %s1491_s30 = sshll.u32 %s379_s29, 3  ;;  %1570 = vmatpush3.bf16.msra.mxu0 %v1706_v7  ;;  %1578 = vmatpush3.bf16.msra.mxu1 %v1707_v8  ;;  %v1492_v16 = vld [vmem:[%s2217_s1] ss:$0 sm:$0xff]  ;;  %v1710_v19 = vld [vmem:[%s2220_s4 + $0x8] sm:$0xff]   ;;  %s1817_s29 = smov 120   ;;  %v706_v55 = vunpack.c.l.s4 %v1819_v54  ;;  %v2017_v60 = vshrl.u32 %v708_v56, 7 }
  0x18   : > { %s381_s14 = scalar_lea.vmem %s2231_s0, %s1491_s30  ;;  %1571 = vmatprep.subr.bf16.mxu0 %v1812_v9  ;;  %1579 = vmatprep.subr.bf16.mxu1 %v1812_v9  ;;  %v1711_v20 = vld [vmem:[%s2221_s5 + $0x8] sm:$0xff]   ;;  %v1712_v22 = vld [vmem:[%s2220_s4] sm:$0xff]   ;;  %s1818_s30 = smov 8   ;;  %v1820_v57 = vmov 1934713408   ;;  %vm904_vm4 = vcmask 130048  }
  0x19   : > { %v1938_v0 = vld [vmem:[%s381_s14] sm:$0xff]  ;;  %1573 = vmatprep.mubr.msk.bf16.mxu0 %vm1813_vm1, %v1812_v9  ;;  %1581 = vmatprep.mubr.msk.bf16.mxu1 %vm1813_vm1, %v1812_v9  ;;  %v1714_v24 = vld [vmem:[%s2222_s6 + $0x8] sm:$0xff]   ;;  %v738_v58 = vunpack.c.l.s4 %v1820_v57  ;;  %v707_v59 = vunpack.c.0.s8 %v706_v55  ;;  %vm1219_vm6 = vcmask 392192   ;;  %vm1367_vm7 = vcmask 523264   ;;  %s1490_s14 = sshll.u32 %s375_s13, 3  ;;  %s1414_s21 = scalar_lea.sflag [#allocation3], %s375_s13 }
  0x1a   : > { %v388_v1 = vsel %vm387_vm0, %v1938_v0, 0.0  ;;  %v1713_v23 = vld [vmem:[%s2221_s5] sm:$0xff]   ;;  %s377_s16 = scalar_lea.vmem [#allocation2], %s1490_s14 }
  0x1b   : > { %389 = vadd.xlane.f32.xlu0 %v388_v1  ;;  %1572 = vmatpush3.bf16.msra.mxu0 %v1708_v10  ;;  %v1715_v25 = vld [vmem:[%s2222_s6] sm:$0xff]   ;;  %v739_v63 = vunpack.c.0.s8 %v738_v58  ;;  %v2020_v1 = vsub.s32 %v707_v59, %v2017_v60 }
  0x1c   : > { %1580 = vmatpush3.bf16.msra.mxu1 %v1709_v11  ;;  %1585 = vmatprep.subr.bf16.mxu0 %v1812_v9 }
  0x1d   : > { %1593 = vmatprep.subr.bf16.mxu1 %v1812_v9  ;;  %v2025_v7 = vsub.s32 %v739_v63, %v2017_v60 }
  0xa4   : > { %v390_v2 = vpop.xlane.xlu0 %389 }
  0xa5   : > { %v392_v3 = vmul.f32 0.03125, %v390_v2 }
  0xa7   : > { %v393_v4 = vsub.f32 %v1938_v0, %v392_v3 }
  0xa9   : > { %v394_v5 = vmul.f32 %v393_v4, %v393_v4 }
  0xab   : > { %v395_v6 = vsel %vm387_vm0, %v394_v5, 0.0 }
  0xac   : > { %396 = vadd.xlane.f32.xlu0 %v395_v6 }
 0x135   : > { %v397_v12 = vpop.xlane.xlu0 %396 }
 0x136   : > { %v398_v13 = vmul.f32 0.03125, %v397_v12 }
 0x138   : > { %v399_v14 = vadd.f32 1e-05, %v398_v13 }
 0x13a   : > { %1728 = vrsqrt.f32 %v399_v14 }
 0x147   : > { %v1729_v15 = vpop.eup %1728 }
 0x148   : > { %v401_v17 = vmul.f32 %v1729_v15, %v393_v4 }
 0x14a   : > { %v408_v18 = vmul.f32 %v1492_v16, %v401_v17 }
 0x14c   : > { %v409_v21 = vpack.c.bf16 %v408_v18, %v408_v18  ;;  %v2034_v18 = vld [vmem:[%s2225_s9] sm:$0xff] }
 0x14e   : > { %1574 = vmatmul.mubr.msk.bf16.vlgmr.msra.gmra.mxu0 %vm387_vm0, %v409_v21  ;;  %1582 = vmatmul.mubr.msk.bf16.vlgmr.msra.gmra.mxu1 %vm387_vm0, %v409_v21 }
 0x14f   : > { %1586 = vmatpush3.bf16.msra.mxu0 %v1710_v19  ;;  %1594 = vmatpush3.bf16.msra.mxu1 %v1711_v20 }
 0x150   : > { %1587 = vmatprep.subr.bf16.mxu0 %v1812_v9  ;;  %1595 = vmatprep.subr.bf16.mxu1 %v1812_v9 }
 0x151   : > { %1589 = vmatprep.mubr.msk.bf16.mxu0 %vm1813_vm1, %v1812_v9  ;;  %1597 = vmatprep.mubr.msk.bf16.mxu1 %vm1813_vm1, %v1812_v9 }
 0x153   : > { %1588 = vmatpush3.bf16.msra.mxu0 %v1712_v22  ;;  %1596 = vmatpush3.bf16.msra.mxu1 %v1713_v23  ;;  %v2043_v23 = vld [vmem:[%s2226_s10] sm:$0xff] }
 0x154   : > { %1601 = vmatprep.subr.bf16.mxu0 %v1812_v9 }
 0x156   : > { %1590 = vmatmul.mubr.msk.bf16.vlgmr.msra.gmra.mxu0 %vm387_vm0, %v409_v21  ;;  %1598 = vmatmul.mubr.msk.bf16.vlgmr.msra.gmra.mxu1 %vm387_vm0, %v409_v21 }
 0x157   : > { %1602 = vmatpush3.bf16.msra.mxu0 %v1714_v24  ;;  %1605 = vmatprep.mubr.msk.bf16.mxu0 %vm1813_vm1, %v1812_v9 }
 0x158   : > { %1603 = vmatprep.subr.bf16.mxu0 %v1812_v9 }
 0x15b   : > { %1604 = vmatpush3.bf16.msra.mxu0 %v1715_v25 }
 0x15e   : > { %1606 = vmatmul.mubr.msk.bf16.vlgmr.msra.gmra.mxu0 %vm387_vm0, %v409_v21 }
 0x20e   : > { %v2002_v26 = vpop.f32.mrf.mxu0  ;;  %v2004_v27 = vpop.f32.mrf.mxu1 }
 0x20f   : > { %700 = vrot.lane.b32.xlu0 %v2002_v26, %s1814_s22  ;;  %694 = vrot.lane.b32.xlu1 %v2002_v26, %s1815_s24  ;;  %s1427_s22 = sshll.u32 %s377_s16, 4  ;;  %s2176_s22 = int_to_ptr.vmem [resolvable:$true] %s1427_s22 }
 0x210   : > { %v1575_v28 = vpop.f32.mrf.mxu0  ;;  %v1583_v29 = vpop.f32.mrf.mxu1 }
 0x212   : > { %v466_v30 = vpop.f32.mrf.mxu0  ;;  %v522_v31 = vpop.f32.mrf.mxu1 }
 0x213   : > { %697 = vrot.lane.b32.xlu1 %v2002_v26, %s1816_s25  ;;  %v892_v30 = vmul.f32 %v2004_v27, %v2034_v18 }
 0x214   : > { %v1576_v32 = vpop.f32.mrf.mxu0  ;;  %v1584_v33 = vpop.f32.mrf.mxu1 }
 0x216   : > { %v575_v34 = vpop.f32.mrf.mxu0  ;;  %v631_v35 = vpop.f32.mrf.mxu1 }
 0x217   : > { %v1009_v36 = vpack.c.bf16 %v575_v34, %v575_v34  ;;  %885 = vrot.lane.b32.xlu1 %v2004_v27, %s1817_s29 }
 0x218   : > { %v1591_v37 = vpop.f32.mrf.mxu0  ;;  %v1599_v38 = vpop.f32.mrf.mxu1 }
 0x219   : > { %v1018_v39 = vsel %vm1016_vm2, %v1009_v36, 0  ;;  %1654 = vmatprep.subr.msk.bf16.mxu0 %vm1016_vm2, %v1009_v36 }
 0x21a   : > { %v578_v40 = vpop.f32.mrf.mxu0  ;;  %v634_v41 = vpop.f32.mrf.mxu1  ;;  %1616 = vmatpush3.bf16.msra.mxu0 %v1018_v39 }
 0x21b   : > { %888 = vrot.lane.b32.xlu1 %v2004_v27, %s1818_s30  ;;  %1641 = vmatprep.subr.bf16.mxu0 %v1812_v9 }
 0x21c   : > { %v1592_v42 = vpop.f32.mrf.mxu0  ;;  %v1600_v43 = vpop.f32.mrf.mxu1 }
 0x21e   : > { %v687_v44 = vpop.f32.mrf.mxu0 }
 0x21f   : > { %v1516_v45 = vmul.f32 -1.442695, %v687_v44 }
 0x220   : > { %v1607_v46 = vpop.f32.mrf.mxu0 }
 0x221   : > { %1730 = vpow2.f32 %v1516_v45 }
 0x222   : > { %v690_v47 = vpop.f32.mrf.mxu0 }
 0x224   : > { %v1608_v48 = vpop.f32.mrf.mxu0 }
 0x22e   : > { %v1731_v49 = vpop.eup %1730 }
 0x22f   : > { %v1233_v50 = vadd.f32 1.0, %v1731_v49 }
 0x231   : > { %1732 = vrcp.f32 %v1233_v50 }
 0x23e   : > { %v1733_v51 = vpop.eup %1732 }
 0x23f   : > { %v1236_v52 = vmul.f32 %v1733_v51, %v687_v44 }
 0x241   : > { %v2014_v53 = vmul.f32 %v1236_v52, %v631_v35 }
 0x281   : > { %v701_v61 = vpop.permute.xlu0 %700  ;;  %v695_v62 = vpop.permute.xlu1 %694 }
 0x282   : > { %v719_v2 = vcombine.low %v695_v62, %v701_v61  ;;  %v720_v3 = vcombine.high %v695_v62, %v701_v61 }
 0x284   : > { %v727_v8 = vrot.slane %v719_v2, %v2020_v1  ;;  %v734_v10 = vrot.slane %v720_v3, %v2020_v1 }
 0x285   : > { %v698_v4 = vpop.permute.xlu1 %697 }
 0x286   : > { %v703_v5 = vcombine.low %v2002_v26, %v698_v4  ;;  %v704_v6 = vcombine.high %v2002_v26, %v698_v4 }
 0x288   : > { %v711_v11 = vrot.slane %v703_v5, %v2020_v1  ;;  %v718_v12 = vrot.slane %v704_v6, %v2020_v1 }
 0x289   : > { %v886_v13 = vpop.permute.xlu1 %885 }
 0x28a   : > { %v735_v14 = vcombine.low %v711_v11, %v727_v8  ;;  %v736_v15 = vcombine.high %v711_v11, %v727_v8  ;;  %v751_v16 = vcombine.low %v718_v12, %v734_v10  ;;  %v752_v17 = vcombine.high %v718_v12, %v734_v10 }
 0x28c   : > { %v743_v19 = vrot.slane %v735_v14, %v2025_v7  ;;  %v750_v20 = vrot.slane %v736_v15, %v2025_v7  ;;  %v759_v21 = vrot.slane %v751_v16, %v2025_v7  ;;  %v766_v22 = vrot.slane %v752_v17, %v2025_v7 }
 0x28d   : > { %v889_v24 = vpop.permute.xlu1 %888 }
 0x28e   : > { %v771_v25 = vcombine.low %v743_v19, %v750_v20  ;;  %v1508_v26 = vcombine.high %v743_v19, %v750_v20  ;;  %v787_v28 = vcombine.low %v759_v21, %v766_v22  ;;  %v1509_v29 = vcombine.high %v759_v21, %v766_v22  ;;  %v1716_v20 = vld [vmem:[%s2224_s8 + $0x38] sm:$0xff]   ;;  %v1717_v22 = vld [vmem:[%s2224_s8 + $0x30] sm:$0xff]  }
 0x28f   : > { %v891_v31 = vsel %vm867_vm3, %v886_v13, %v889_v24  ;;  %v1720_v24 = vld [vmem:[%s2224_s8 + $0x18] sm:$0xff]  }
 0x290   : > { %v893_v32 = vmul.f32 %v891_v31, %v2043_v23  ;;  %v778_v33 = vrot.slane %v771_v25, %v2020_v1  ;;  %v786_v34 = vrot.slane %v1508_v26, %v2020_v1  ;;  %v794_v35 = vrot.slane %v787_v28, %v2020_v1  ;;  %v1721_v25 = vld [vmem:[%s2224_s8 + $0x10] sm:$0xff]   ;;  %v1722_v26 = vld [vmem:[%s2224_s8 + $0x8] sm:$0xff]   ;;  %v1723_v28 = vld [vmem:[%s2224_s8] sm:$0xff]  }
 0x291   : > { %v802_v36 = vrot.slane %v1509_v29, %v2020_v1  ;;  %v1238_v29 = vpack.c.bf16 %v2014_v53, %v2014_v53 }
 0x292   : > { %v894_v37 = vadd.f32 %v893_v32, %v892_v30  ;;  %v804_v38 = vcombine.high %v778_v33, %v786_v34  ;;  %v803_v39 = vcombine.low %v778_v33, %v786_v34  ;;  %v901_v30 = vand.u32 127, %v708_v56 }
 0x293   : > { %v820_v40 = vcombine.high %v794_v35, %v802_v36  ;;  %v819_v41 = vcombine.low %v794_v35, %v802_v36 }
 0x294   : > { %v897_v42 = vpack.c.bf16 %v894_v37, %v894_v37  ;;  %v818_v27 = vrot.slane %v804_v38, %v2025_v7  ;;  %v811_v43 = vrot.slane %v803_v39, %v2025_v7  ;;  %vm902_vm5 = vcmp.gt.s32.totalorder %v901_v30, %v2017_v60 }
 0x295   : > { %v834_v44 = vrot.slane %v820_v40, %v2025_v7  ;;  %v827_v45 = vrot.slane %v819_v41, %v2025_v7  ;;  %v903_v32 = vsel %vm902_vm5, -1e+30, %v1812_v9 }
 0x296   : > { %1653 = vmatprep.subr.msk.bf16.mxu1 %vm904_vm4, %v897_v42  ;;  %v912_v46 = vsel %vm904_vm4, %v897_v42, 0 }
 0x297   : > { %1610 = vmatpush3.bf16.xpose.msra.mxu1 %v912_v46  ;;  %v837_v47 = vcombine.low %v818_v27, %v834_v44  ;;  %v835_v48 = vcombine.low %v811_v43, %v827_v45  ;;  %v836_v49 = vcombine.high %v811_v43, %v827_v45  ;;  %v838_v50 = vcombine.high %v818_v27, %v834_v44 }
 0x298   : > { %1621 = vmatprep.subr.bf16.mxu1 %v1812_v9 }
 0x299   : > { %847 = vrot.lane.b32.xlu0 %v837_v47, %s1817_s29  ;;  %843 = vrot.lane.b32.xlu1 %v835_v48, %s1817_s29  ;;  %v872_v63 = vmul.f32 %v835_v48, %v2034_v18  ;;  %v873_v2 = vmul.f32 %v836_v49, %v2034_v18  ;;  %v874_v14 = vmul.f32 %v837_v47, %v2034_v18 }
 0x29a   : > { %v875_v15 = vmul.f32 %v838_v50, %v2034_v18  ;;  %v1718_v18 = vld [vmem:[%s2224_s8 + $0x28] sm:$0xff]  }
 0x29d   : > { %859 = vrot.lane.b32.xlu0 %v837_v47, %s1818_s30  ;;  %845 = vrot.lane.b32.xlu1 %v836_v49, %s1817_s29 }
 0x2a1   : > { %855 = vrot.lane.b32.xlu1 %v835_v48, %s1818_s30 }
 0x2a5   : > { %857 = vrot.lane.b32.xlu1 %v836_v49, %s1818_s30 }
 0x2a9   : > { %849 = vrot.lane.b32.xlu1 %v838_v50, %s1817_s29  ;;  %s1821_s29 = smov 32  }
 0x2ad   : > { %861 = vrot.lane.b32.xlu1 %v838_v50, %s1818_s30  ;;  %s1822_s30 = smov 16  }
 0x30b   : > { %v844_v51 = vpop.permute.xlu1 %843  ;;  %v848_v54 = vpop.permute.xlu0 %847 }
 0x30f   : > { %v846_v52 = vpop.permute.xlu1 %845  ;;  %v860_v62 = vpop.permute.xlu0 %859 }
 0x310   : > { %v870_v8 = vsel %vm867_vm3, %v848_v54, %v860_v62 }
 0x311   : > { %v878_v11 = vmul.f32 %v870_v8, %v2043_v23 }
 0x313   : > { %v856_v55 = vpop.permute.xlu1 %855  ;;  %v882_v17 = vadd.f32 %v878_v11, %v874_v14 }
 0x314   : > { %v868_v57 = vsel %vm867_vm3, %v844_v51, %v856_v55 }
 0x315   : > { %v876_v58 = vmul.f32 %v868_v57, %v2043_v23 }
 0x317   : > { %v858_v59 = vpop.permute.xlu1 %857  ;;  %v880_v4 = vadd.f32 %v876_v58, %v872_v63 }
 0x318   : > { %v869_v61 = vsel %vm867_vm3, %v846_v52, %v858_v59 }
 0x319   : > { %v877_v3 = vmul.f32 %v869_v61, %v2043_v23 }
 0x31b   : > { %v881_v5 = vadd.f32 %v877_v3, %v873_v2  ;;  %v850_v6 = vpop.permute.xlu1 %849 }
 0x31d   : > { %v895_v10 = vpack.c.bf16 %v881_v5, %v880_v4 }
 0x31f   : > { %1611 = vmatprep.mubr.msk.bf16.mxu1 %vm904_vm4, %v895_v10  ;;  %v862_v12 = vpop.permute.xlu1 %861 }
 0x320   : > { %v871_v13 = vsel %vm867_vm3, %v850_v6, %v862_v12 }
 0x321   : > { %v879_v16 = vmul.f32 %v871_v13, %v2043_v23  ;;  %v1719_v23 = vld [vmem:[%s2224_s8 + $0x20] sm:$0xff]  }
 0x323   : > { %v883_v19 = vadd.f32 %v879_v16, %v875_v15 }
 0x325   : > { %v896_v21 = vpack.c.bf16 %v883_v19, %v882_v17 }
 0x327   : > { %1612 = vmatmul.mubr.msk.bf16.vlgmr.msra.gmra.mxu1 %vm904_vm4, %v896_v21 }
 0x328   : > { %1622 = vmatpush3.bf16.msra.mxu1 %v1716_v20  ;;  %1637 = vmatprep.mubr.msk.bf16.mxu1 %vm1813_vm1, %v1812_v9 }
 0x329   : > { %1623 = vmatprep.subr.bf16.mxu1 %v1812_v9 }
 0x32c   : > { %1624 = vmatpush3.bf16.msra.mxu1 %v1717_v22  ;;  %v1724_v22 = vld [vmem:[%s2223_s7 + $0x18] sm:$0xff]  }
 0x32d   : > { %1625 = vmatprep.subr.bf16.mxu1 %v1812_v9 }
 0x330   : > { %1626 = vmatpush3.bf16.msra.mxu1 %v1718_v18  ;;  %v1725_v18 = vld [vmem:[%s2223_s7 + $0x10] sm:$0xff]  }
 0x331   : > { %1627 = vmatprep.subr.bf16.mxu1 %v1812_v9 }
 0x334   : > { %1628 = vmatpush3.bf16.msra.mxu1 %v1719_v23 }
 0x335   : > { %1629 = vmatprep.subr.bf16.mxu1 %v1812_v9 }
 0x338   : > { %1630 = vmatpush3.bf16.msra.mxu1 %v1720_v24 }
 0x339   : > { %1631 = vmatprep.subr.bf16.mxu1 %v1812_v9 }
 0x33c   : > { %1632 = vmatpush3.bf16.msra.mxu1 %v1721_v25 }
 0x33d   : > { %1633 = vmatprep.subr.bf16.mxu1 %v1812_v9 }
 0x340   : > { %1634 = vmatpush3.bf16.msra.mxu1 %v1722_v26 }
 0x341   : > { %1635 = vmatprep.subr.bf16.mxu1 %v1812_v9 }
 0x344   : > { %1636 = vmatpush3.bf16.msra.mxu1 %v1723_v28 }
 0x347   : > { %1638 = vmatmul.mubr.bf16.vlgmr.msra.gmra.mxu1 %v1238_v29 }
 0x3e7   : > { %v1613_v31 = vpop.f32.mrf.mxu1 }
 0x3e8   : > { %v957_v36 = vadd.f32 %v1613_v31, %v903_v32 }
 0x3e9   : > { %v948_v33 = vpop.f32.mrf.mxu1 }
 0x3ea   : > { %v949_v34 = vadd.f32 %v948_v33, %v903_v32  ;;  %v969_v41 = vsel %vm867_vm3, %v957_v36, -inf }
 0x3eb   : > { %v1614_v35 = vpop.f32.mrf.mxu1 }
 0x3ec   : > { %v963_v37 = vsel %vm867_vm3, %v949_v34, -inf  ;;  %v960_v40 = vadd.f32 %v1614_v35, %v903_v32 }
 0x3ed   : > { %v951_v38 = vpop.f32.mrf.mxu1  ;;  %964 = vmax.xlane.f32.xlu0 %v963_v37 }
 0x3ee   : > { %v952_v39 = vadd.f32 %v951_v38, %v903_v32  ;;  %v972_v56 = vsel %vm867_vm3, %v960_v40, -inf }
 0x3f0   : > { %v966_v53 = vsel %vm867_vm3, %v952_v39, -inf }
 0x3f1   : > { %967 = vmax.xlane.f32.xlu1 %v966_v53  ;;  %970 = vmax.xlane.f32.xlu0 %v969_v41 }
 0x3f5   : > { %973 = vmax.xlane.f32.xlu0 %v972_v56 }
 0x407   : > { %v2124_v60 = vpop.f32.mrf.mxu1 }
 0x409   : > { %v1639_v42 = vpop.f32.mrf.mxu1 }
 0x40b   : > { %v1340_v27 = vpop.f32.mrf.mxu1 }
 0x40d   : > { %v1640_v43 = vpop.f32.mrf.mxu1 }
 0x476   : > { %v965_v44 = vpop.xlane.xlu0 %964 }
 0x477   : > { %v975_v45 = vsub.f32 %v949_v34, %v965_v44 }
 0x479   : > { %v979_v46 = vmul.f32 1.442695, %v975_v45 }
 0x47a   : > { %v968_v47 = vpop.xlane.xlu1 %967  ;;  %v971_v48 = vpop.xlane.xlu0 %970 }
 0x47b   : > { %1734 = vpow2.f32 %v979_v46  ;;  %v976_v49 = vsub.f32 %v952_v39, %v968_v47  ;;  %v977_v50 = vsub.f32 %v957_v36, %v971_v48  ;;  %v1727_v46 = vld [vmem:[%s2223_s7] sm:$0xff]  }
 0x47d   : > { %v981_v51 = vmul.f32 1.442695, %v976_v49  ;;  %v983_v52 = vmul.f32 1.442695, %v977_v50 }
 0x47e   : > { %v974_v54 = vpop.xlane.xlu0 %973 }
 0x47f   : > { %1736 = vpow2.f32 %v981_v51  ;;  %v978_v55 = vsub.f32 %v960_v40, %v974_v54  ;;  %v1726_v40 = vld [vmem:[%s2223_s7 + $0x8] sm:$0xff]  }
 0x480   : > { %1738 = vpow2.f32 %v983_v52 }
 0x481   : > { %v985_v57 = vmul.f32 1.442695, %v978_v55 }
 0x483   : > { %1740 = vpow2.f32 %v985_v57 }
 0x488   : > { %v1735_v58 = vpop.eup %1734 }
 0x489   : > { %v987_v59 = vsel %vm867_vm3, %v1735_v58, 0.0 }
 0x48a   : > { %988 = vadd.xlane.f32.xlu1 %v987_v59 }
 0x48c   : > { %v1737_v61 = vpop.eup %1736 }
 0x48d   : > { %v1739_v62 = vpop.eup %1738  ;;  %v990_v63 = vsel %vm867_vm3, %v1737_v61, 0.0 }
 0x48e   : > { %991 = vadd.xlane.f32.xlu0 %v990_v63  ;;  %v993_v2 = vsel %vm867_vm3, %v1739_v62, 0.0 }
 0x48f   : > { %994 = vadd.xlane.f32.xlu1 %v993_v2 }
 0x490   : > { %v1741_v3 = vpop.eup %1740 }
 0x491   : > { %v996_v4 = vsel %vm867_vm3, %v1741_v3, 0.0 }
 0x492   : > { %997 = vadd.xlane.f32.xlu0 %v996_v4 }
 0x513   : > { %v989_v5 = vpop.xlane.xlu1 %988 }
 0x514   : > { %1742 = vrcp.f32 %v989_v5 }
 0x517   : > { %v992_v6 = vpop.xlane.xlu0 %991 }
 0x518   : > { %v995_v8 = vpop.xlane.xlu1 %994  ;;  %1744 = vrcp.f32 %v992_v6 }
 0x519   : > { %1746 = vrcp.f32 %v995_v8 }
 0x51b   : > { %v998_v10 = vpop.xlane.xlu0 %997 }
 0x51c   : > { %1748 = vrcp.f32 %v998_v10 }
 0x521   : > { %v1743_v11 = vpop.eup %1742 }
 0x522   : > { %v1003_v13 = vmul.f32 %v1743_v11, %v1735_v58 }
 0x525   : > { %v1745_v12 = vpop.eup %1744 }
 0x526   : > { %v1004_v14 = vmul.f32 %v1745_v12, %v1737_v61  ;;  %v1747_v15 = vpop.eup %1746 }
 0x527   : > { %v1005_v19 = vmul.f32 %v1747_v15, %v1739_v62 }
 0x528   : > { %v1007_v16 = vpack.c.bf16 %v1004_v14, %v1003_v13 }
 0x529   : > { %v1749_v17 = vpop.eup %1748 }
 0x52a   : > { %1617 = vmatprep.mubr.msk.bf16.mxu0 %vm867_vm3, %v1007_v16  ;;  %v1006_v20 = vmul.f32 %v1749_v17, %v1741_v3 }
 0x52c   : > { %v1008_v21 = vpack.c.bf16 %v1006_v20, %v1005_v19 }
 0x52e   : > { %1618 = vmatmul.mubr.msk.bf16.vlgmr.msra.gmra.mxu0 %vm867_vm3, %v1008_v21 }
 0x52f   : > { %1649 = vmatprep.mubr.msk.bf16.mxu0 %vm1813_vm1, %v1812_v9  ;;  %1642 = vmatpush3.bf16.msra.mxu0 %v1724_v22 }
 0x530   : > { %1643 = vmatprep.subr.bf16.mxu0 %v1812_v9 }
 0x533   : > { %1644 = vmatpush3.bf16.msra.mxu0 %v1725_v18 }
 0x534   : > { %1645 = vmatprep.subr.bf16.mxu0 %v1812_v9 }
 0x537   : > { %1646 = vmatpush3.bf16.msra.mxu0 %v1726_v40 }
 0x538   : > { %1647 = vmatprep.subr.bf16.mxu0 %v1812_v9 }
 0x53b   : > { %1648 = vmatpush3.bf16.msra.mxu0 %v1727_v46 }
 0x5ee   : > { %v1619_v23 = vpop.f32.mrf.mxu0 }
 0x5f0   : > { %v1054_v24 = vpop.f32.mrf.mxu0 }
 0x5f1   : > { %v1069_v26 = vcombine.low %v1054_v24, %v1619_v23  ;;  %v1070_v28 = vcombine.high %v1054_v24, %v1619_v23 }
 0x5f2   : > { %v1620_v25 = vpop.f32.mrf.mxu0 }
 0x5f3   : > { %v1077_v32 = vrot.slane %v1069_v26, %v2020_v1  ;;  %v1084_v33 = vrot.slane %v1070_v28, %v2020_v1 }
 0x5f4   : > { %v1057_v29 = vpop.f32.mrf.mxu0 }
 0x5f5   : > { %v1085_v30 = vcombine.low %v1057_v29, %v1620_v25  ;;  %v1086_v31 = vcombine.high %v1057_v29, %v1620_v25 }
 0x5f7   : > { %v1093_v34 = vrot.slane %v1085_v30, %v2020_v1  ;;  %v1100_v35 = vrot.slane %v1086_v31, %v2020_v1 }
 0x5f9   : > { %v1101_v36 = vcombine.low %v1077_v32, %v1093_v34  ;;  %v1102_v37 = vcombine.high %v1077_v32, %v1093_v34  ;;  %v1117_v38 = vcombine.low %v1084_v33, %v1100_v35  ;;  %v1118_v39 = vcombine.high %v1084_v33, %v1100_v35 }
 0x5fb   : > { %v1109_v53 = vrot.slane %v1101_v36, %v2025_v7  ;;  %v1116_v41 = vrot.slane %v1102_v37, %v2025_v7  ;;  %v1125_v56 = vrot.slane %v1117_v38, %v2025_v7  ;;  %v1132_v42 = vrot.slane %v1118_v39, %v2025_v7 }
 0x5fd   : > { %v1137_v27 = vcombine.low %v1109_v53, %v1116_v41  ;;  %v1514_v43 = vcombine.high %v1109_v53, %v1116_v41  ;;  %v1153_v44 = vcombine.low %v1125_v56, %v1132_v42  ;;  %v1515_v45 = vcombine.high %v1125_v56, %v1132_v42 }
 0x5ff   : > { %v1144_v47 = vrot.slane %v1137_v27, %v2020_v1  ;;  %v1152_v48 = vrot.slane %v1514_v43, %v2020_v1  ;;  %v1160_v49 = vrot.slane %v1153_v44, %v2020_v1  ;;  %v1168_v50 = vrot.slane %v1515_v45, %v2020_v1 }
 0x601   : > { %v1170_v51 = vcombine.high %v1144_v47, %v1152_v48  ;;  %v1186_v52 = vcombine.high %v1160_v49, %v1168_v50  ;;  %v1169_v9 = vcombine.low %v1144_v47, %v1152_v48  ;;  %v1185_v54 = vcombine.low %v1160_v49, %v1168_v50 }
 0x603   : > { %v1184_v55 = vrot.slane %v1170_v51, %v2025_v7  ;;  %v1200_v57 = vrot.slane %v1186_v52, %v2025_v7  ;;  %v1177_v58 = vrot.slane %v1169_v9, %v2025_v7  ;;  %v1193_v59 = vrot.slane %v1185_v54, %v2025_v7 }
 0x605   : > { %v1203_v61 = vcombine.low %v1184_v55, %v1200_v57  ;;  %v1202_v62 = vcombine.high %v1177_v58, %v1193_v59  ;;  %v1201_v63 = vcombine.low %v1177_v58, %v1193_v59  ;;  %v1204_v1 = vcombine.high %v1184_v55, %v1200_v57 }
 0x607   : > { %1210 = vrot.lane.b32.xlu0 %v1203_v61, %s1821_s29  ;;  %1206 = vrot.lane.b32.xlu1 %v1202_v62, %s1822_s30  ;;  %s2174_s29 = scalar_lea.hbm %s2227_s11, %s1531_s15  ;;  %s1750_s30 = scalar_lea.vmem %s2176_s22, 128 }
 0x608   : > { %p1751_p11 = scmp.ne.s32.totalorder %s2176_s22, %s1750_s30 }
 0x60a   : > { %p1752_p12 = pnand %p1751_p11, %p1923_p5 }
 0x60b   : > { %1214 = vrot.lane.b32.xlu1 %v1204_v1, %s1823_s12  ;;  %s1824_s12 = smov [#allocation2]  }
 0x60c   : > { %p1753_p13 = pneg %p1752_p12  ;;  %s1754_s14 = sshll.u32 %s1824_s12, 4  ;;  %s1755_s14 = int_to_ptr.vmem [resolvable:$false] %s1754_s14 }
 0x60d   : > { %s1756_s15 = scalar_lea.vmem %s1755_s14, 256  ;;  %p1757_p0 = scmp.lt.s32.totalorder %s2176_s22, %s1755_s14 }
 0x60e   : > { %p1758_p1 = scmp.lt.s32.totalorder %s1756_s15, %s1750_s30 }
 0x610   : > { %p1759_p2 = por %p1758_p1, %p1757_p0 }
 0x612   : > { %p1760_p3 = pnand %p1759_p2, %p1753_p13 }
 0x679   : > { %v1207_v2 = vpop.permute.xlu1 %1206  ;;  %v1211_v3 = vpop.permute.xlu0 %1210 }
 0x67a   : > { %v1217_v4 = vsel %vm904_vm4, %v1201_v63, %v1207_v2 }
 0x67b   : > { %v1218_v7 = vsel %vm387_vm0, %v1217_v4, %v1211_v3 }
 0x67d   : > { %v1215_v5 = vpop.permute.xlu1 %1214 }
 0x67e   : > { %v1220_v6 = vsel %vm1219_vm6, %v1218_v7, %v1215_v5 }
 0x67f   : > { %v1221_v8 = vpack.c.bf16 %v1220_v6, %v1220_v6 }
 0x681   : > { %1650 = vmatmul.mubr.msk.bf16.vlgmr.msra.gmra.mxu0 %vm1367_vm7, %v1221_v8 }
 0x741   : > { %v1405_v10 = vpop.f32.mrf.mxu0 }
 0x742   : > { %v1406_v11 = vadd.f32 %v1405_v10, %v2124_v60 }
 0x743   : > { %v1651_v12 = vpop.f32.mrf.mxu0 }
 0x744   : > { %v1411_v13 = vadd.f32 %v1406_v11, %v1938_v0 }
 0x745   : > { %v1408_v14 = vpop.f32.mrf.mxu0 }
 0x746   : > { %1412 = vst.msk [vmem:[%s377_s16] sm:$0xff] %vm387_vm0, %v1411_v13 }
 0x747   : > { %v1652_v15 = vpop.f32.mrf.mxu0 }
 0x748   : > { %1763 = shalt.err (!%p1760_p3)
}
 0x749   : > { %s1764_s16 = scalar_lea.hbm %s2174_s29, 128  ;;  %s1768_s25 = scalar_lea.hbm %s2227_s11, 256 }
 0x74a   : > { %p1765_p4 = scmp.ne.s32.totalorder %s2174_s29, %s1764_s16  ;;  %p1769_p9 = scmp.lt.s32.totalorder %s2174_s29, %s2227_s11 }
 0x74b   : > { %p1770_p10 = scmp.lt.s32.totalorder %s1768_s25, %s1764_s16 }
 0x74c   : > { %p1766_p7 = pnand %p1765_p4, %p1923_p5 }
 0x74d   : > { %p1771_p11 = por %p1770_p10, %p1769_p9 }
 0x74e   : > { %p1767_p8 = pneg %p1766_p7 }
 0x750   : > { %p1772_p12 = pnand %p1771_p11, %p1767_p8 }
 0x752   : > { %1775 = shalt.err (!%p1772_p12)
}
 0x753   : > { %1655 = dma.vmem_to_hbm [thread:$0]  (%p1923_p5), %s2176_s22, 128, %s2174_s29, %s1414_s21  }
 0x754 PF: > { %p1661_p13 = scmp.ge.s32.totalorder %s1810_s20, 2  ;;  %s1439_s30 = sand.u32 1, %s1798_s17  }
 0x755   : > { %s1440_s0 = scalar_lea.sflag [#allocation3], %s1439_s30 }
 0x756   : > { %p1658_p0 = pnand %p1661_p13, %p1927_p6 }
 0x758   : > { %p1659_p1 = pneg %p1658_p0 }
 0x75a   : > { %1793 = dma.done.wait (%p1659_p1), %s1440_s0, 128  }
 0x75b   : > { %1795 = vsyncadd (%p1659_p1), %s1440_s0, 4294967168  ;;  %p21_p2 = scmp.ge.s32.totalorder %s1910_s23, 4   ;;  %s2232_s17 = smov %s1802_s18 }
 0x75c   : > { %s2233_s18 = smov %s1806_s19  ;;  %s2234_s19 = smov %s1921_s26 }
 0x75d   : > { %s2235_s20 = smov %s1910_s23  ;;  %23 = sbr.rel (!%p21_p2) target bundleno = 5 (0x5), region = 99 }
 0x762   :  { %1445 = vsyncpa [#allocation3], 1 }
 0x763   :  { %1447 = vsyncpa [#allocation3 + $0x1], 1 }

</bundles_post_ra>
